<compile_context>
chip_gen: v7x
topology: tpu7x:2x2x1
jax: 0.10.0
libtpu: 0.0.40
codegen_flags: <defaults>
</compile_context>

<pallas_src>
import functools

import numpy as np
import jax
import jax.numpy as jnp
from jax.experimental import pallas as pl
from jax.experimental.pallas import tpu as pltpu


def _round_up(x, m):
    return ((x + m - 1) // m) * m


def _vmem_capacity_bytes():
    try:
        return int(pltpu.get_tpu_info().vmem_capacity_bytes)
    except Exception:
        return 64 << 20  # conservative (v7x per-TensorCore VMEM)


@functools.lru_cache(maxsize=16)
def _dft_basis_split(T, sample_rate, F_pad, dtype):
    """cos / -sin real-DFT bases, sqrt(1/(T*sr)) folded in, lane-padded.

    Built in float64 numpy with integer (n*k) mod T so the angle stays exact
    for large T, then cast to the compute dtype and cached on device.
    Returns (cos, msin), each (T, F_pad)."""
    F = T // 2 + 1
    n = np.arange(T, dtype=np.int64)[:, None]
    k = np.arange(F, dtype=np.int64)[None, :]
    ang = (2.0 * np.pi / T) * ((n * k) % T).astype(np.float64)
    s = np.sqrt(1.0 / (float(T) * float(sample_rate)))
    cos_m = np.cos(ang) * s
    msin_m = -np.sin(ang) * s
    pad = F_pad - F
    if pad:
        cos_m = np.pad(cos_m, ((0, 0), (0, pad)))
        msin_m = np.pad(msin_m, ((0, 0), (0, pad)))
    return (jnp.asarray(cos_m, dtype=dtype), jnp.asarray(msin_m, dtype=dtype))


@functools.lru_cache(maxsize=16)
def _dft_basis_concat(T, sample_rate, F_pad, dtype):
    cos_m, msin_m = _dft_basis_split(T, sample_rate, F_pad, dtype)
    return jnp.concatenate([cos_m, msin_m], axis=1)  # (T, 2*F_pad)


def _pick_tm(rows, T):
    # Small T -> fat row tiles amortize the ~0.35us/step overhead; large T ->
    # small row tiles keep the x / out tiles small next to the basis.
    if T <= 256:
        tm = 512
    elif T <= 1024:
        tm = 256
    elif T <= 4096:
        tm = 128
    else:
        tm = 64
    if rows >= 32:
        # v7x has 2 TensorCores; keep >= 2 row tiles so the parallel axis
        # can shard across them.
        tm = min(tm, _round_up((rows + 1) // 2, 16))
    tm = min(tm, _round_up(rows, 16))
    return max(tm, 16)


def _psd_kernel_resident(F_pad, prob):
    def kernel(x_ref, basis_ref, o_ref):
        # Single wide MXU matmul: [TM, T] @ [T, 2*F_pad] -> [TM, 2*F_pad] (f32 acc)
        y = jnp.dot(x_ref[...], basis_ref[...],
                    preferred_element_type=jnp.float32)
        re = y[:, :F_pad]           # static, 128-aligned slices
        im = y[:, F_pad:]
        p = re * re + im * im       # scale already folded into the basis
        if prob:
            s = jnp.sum(p, axis=-1, keepdims=True)
            # clamp: padded (all-zero) rows would otherwise produce inf/NaN
            p = p * pl.reciprocal(jnp.maximum(s, 1e-30), approx=True)
        o_ref[...] = p
    return kernel


def _psd_kernel_freq_tiled(x_ref, cos_ref, msin_ref, o_ref):
    x = x_ref[...]
    re = jnp.dot(x, cos_ref[...], preferred_element_type=jnp.float32)
    im = jnp.dot(x, msin_ref[...], preferred_element_type=jnp.float32)
    o_ref[...] = re * re + im * im


def psd_pallas(signal, sample_rate, prob=False, dim=-1,
               compute_dtype=jnp.bfloat16, force_freq_tiled=False):
    """Real-signal PSD along `dim`. Returns (psd, freqs)."""
    signal = jnp.asarray(signal)
    if jnp.issubdtype(signal.dtype, jnp.complexfloating):
        # TODO(synk): complex-signal path (full fft + fftfreq) not implemented.
        raise NotImplementedError("complex-input PSD path not implemented")
    signal = signal.astype(jnp.float32)

    ndim = signal.ndim
    moved = (dim % ndim) != (ndim - 1)
    if moved:
        signal = jnp.moveaxis(signal, dim, -1)

    shape = signal.shape
    T = shape[-1]
    F = T // 2 + 1
    F_pad = _round_up(F, 128)
    rows = int(np.prod(shape[:-1])) if len(shape) > 1 else 1

    cdt = np.dtype(compute_dtype)
    itemsize = cdt.itemsize

    x2 = signal.reshape(rows, T).astype(cdt)
    TM = _pick_tm(rows, T)
    rows_pad = _round_up(rows, TM)
    if rows_pad != rows:
        x2 = jnp.pad(x2, ((0, rows_pad - rows), (0, 0)))
    num_row_tiles = rows_pad // TM

    capacity = _vmem_capacity_bytes()
    budget = capacity - (8 << 20)           # headroom

    # Resident-basis footprint: basis is double-buffered by the constant-index
    # BlockSpec (but only DMA'd once), x / out tiles are double-buffered.
    basis_bytes = T * 2 * F_pad * itemsize
    resident_need = (2 * basis_bytes
                     + 2 * TM * T * itemsize
                     + 2 * TM * F_pad * 4
                     + (2 << 20))
    use_resident = (not force_freq_tiled) and (resident_need <= budget)

    if use_resident:
        basis = _dft_basis_concat(T, float(sample_rate), F_pad, cdt)
        vmem_limit = int(min(max(resident_need + (4 << 20), 32 << 20),
                             capacity - (4 << 20)))
        psd_pad = pl.pallas_call(
            _psd_kernel_resident(F_pad, prob),
            out_shape=jax.ShapeDtypeStruct((rows_pad, F_pad), jnp.float32),
            grid=(num_row_tiles,),
            in_specs=[
                pl.BlockSpec((TM, T), lambda i: (i, 0)),          # row tiles stream
                pl.BlockSpec((T, 2 * F_pad), lambda i: (0, 0)),   # basis resident
            ],
            out_specs=pl.BlockSpec((TM, F_pad), lambda i: (i, 0)),
            compiler_params=pltpu.CompilerParams(
                dimension_semantics=("parallel",),
                vmem_limit_bytes=vmem_limit),
        )(x2, basis)
    else:
        # Frequency-tiled fallback: cos / -sin tiled along the lane axis.
        cos_m, msin_m = _dft_basis_split(T, float(sample_rate), F_pad, cdt)
        TN = 128
        for cand in (2048, 1024, 512, 256, 128):
            if F_pad % cand:
                continue
            need = (2 * 2 * T * cand * itemsize
                    + 2 * TM * T * itemsize
                    + 2 * TM * cand * 4 + (2 << 20))
            if need <= budget:
                TN = cand
                break
        tiled_need = (2 * 2 * T * TN * itemsize
                      + 2 * TM * T * itemsize
                      + 2 * TM * TN * 4 + (2 << 20))
        vmem_limit = int(min(max(tiled_need + (4 << 20), 32 << 20),
                             capacity - (4 << 20)))
        num_freq_tiles = F_pad // TN
        psd_pad = pl.pallas_call(
            _psd_kernel_freq_tiled,
            out_shape=jax.ShapeDtypeStruct((rows_pad, F_pad), jnp.float32),
            grid=(num_row_tiles, num_freq_tiles),
            in_specs=[
                pl.BlockSpec((TM, T), lambda i, j: (i, 0)),   # x resident per row tile
                pl.BlockSpec((T, TN), lambda i, j: (0, j)),   # cos tile
                pl.BlockSpec((T, TN), lambda i, j: (0, j)),   # -sin tile
            ],
            out_specs=pl.BlockSpec((TM, TN), lambda i, j: (i, j)),
            compiler_params=pltpu.CompilerParams(
                dimension_semantics=("parallel", "arbitrary"),
                vmem_limit_bytes=vmem_limit),
        )(x2, cos_m, msin_m)

    psd = psd_pad
    if rows_pad != rows or F_pad != F:
        psd = psd[:rows, :F]
    psd = psd.reshape(shape[:-1] + (F,))
    if prob and not use_resident:
        # TODO(synk): in-kernel normalization for the freq-tiled fallback path.
        psd = psd / jnp.sum(psd, axis=-1, keepdims=True)
    if moved:
        psd = jnp.moveaxis(psd, -1, dim)

    freqs = jnp.arange(F, dtype=jnp.float32) * (float(sample_rate) / T)
    return psd, freqs


if __name__ == "__main__":
    key = jax.random.PRNGKey(0)
    B, C, T = 2, 4, 16
    sample_rate = 128.0
    x = jax.random.normal(key, (B, C, T), dtype=jnp.float32)

    # Reference (same math as the torch module).
    ref_fft = jnp.fft.rfft(x, axis=-1)
    ref_psd = (jnp.abs(ref_fft) ** 2) / T * (1.0 / sample_rate)
    ref_freqs = jnp.fft.rfftfreq(T, d=1.0 / sample_rate)
    ref_prob = ref_psd / ref_psd.sum(axis=-1, keepdims=True)

    # Default bf16 MXU path (f32 accumulation) -> slightly loose tolerance.
    psd, freqs = psd_pallas(x, sample_rate, prob=False)
    psd = jax.block_until_ready(psd)
    freqs = jax.block_until_ready(freqs)
    assert psd.shape == (B, C, T // 2 + 1)
    assert freqs.shape == (T // 2 + 1,)
    np.testing.assert_allclose(np.asarray(psd), np.asarray(ref_psd),
                               rtol=5e-2, atol=5e-4)
    np.testing.assert_allclose(np.asarray(freqs), np.asarray(ref_freqs),
                               rtol=1e-6, atol=1e-6)

    # float32 compute path.
    psd32, _ = psd_pallas(x, sample_rate, prob=False,
                          compute_dtype=jnp.float32)
    psd32 = jax.block_until_ready(psd32)
    np.testing.assert_allclose(np.asarray(psd32), np.asarray(ref_psd),
                               rtol=5e-2, atol=5e-4)

    # prob=True branch (in-kernel normalization, approx reciprocal).
    psd_p, _ = psd_pallas(x, sample_rate, prob=True)
    psd_p = jax.block_until_ready(psd_p)
    np.testing.assert_allclose(np.asarray(psd_p), np.asarray(ref_prob),
                               rtol=5e-2, atol=5e-4)

    # Exercise the frequency-tiled fallback path (used automatically when the
    # resident basis would not fit VMEM, e.g. large T on v7x).
    psd_t, _ = psd_pallas(x, sample_rate, prob=True, force_freq_tiled=True,
                          compute_dtype=jnp.float32)
    psd_t = jax.block_until_ready(psd_t)
    np.testing.assert_allclose(np.asarray(psd_t), np.asarray(ref_prob),
                               rtol=5e-2, atol=5e-4)

    print("KERNEL_OK")
</pallas_src>

<mosaic_0001>
module attributes {stable_mosaic.version = 11 : i64} {
  func.func @kernel(%arg0: i32, %arg1: memref<16x16xbf16, #tpu.memory_space<vmem>>, %arg2: memref<16x256xbf16, #tpu.memory_space<vmem>>, %arg3: memref<16x128xf32, #tpu.memory_space<vmem>>) attributes {dimension_semantics = [#tpu.dimension_semantics<parallel>], iteration_bounds = array<i64: 1>, scalar_prefetch = 0 : i64, scratch_operands = 0 : i64, tpu.core_type = #tpu.core_type<tc>, window_params = [{transform_indices = @transform_0, window_bounds = array<i64: 16, 16>}, {pipeline_mode = #tpu.pipeline_mode<synchronous>, transform_indices = @transform_1, window_bounds = array<i64: 16, 256>}, {transform_indices = @transform_2, window_bounds = array<i64: 16, 128>}]} {
    %c0 = arith.constant 0 : index
    %c0_0 = arith.constant 0 : index
    %0 = vector.load %arg1[%c0, %c0_0] : memref<16x16xbf16, #tpu.memory_space<vmem>>, vector<16x16xbf16>
    %c0_1 = arith.constant 0 : index
    %c0_2 = arith.constant 0 : index
    %1 = vector.load %arg2[%c0_1, %c0_2] : memref<16x256xbf16, #tpu.memory_space<vmem>>, vector<16x256xbf16>
    %cst = arith.constant dense<0.000000e+00> : vector<16x256xf32>
    %2 = tpu.matmul %0, %1, %cst {dimension_numbers = #tpu.dot_dimension_numbers<[1], [0], [0], [1], [0, 0, 1, 1], [], []>} : vector<16x16xbf16>, vector<16x256xbf16>, vector<16x256xf32> -> vector<16x256xf32>
    %3 = vector.extract_strided_slice %2 {offsets = [0, 0], sizes = [16, 128], strides = [1, 1]} : vector<16x256xf32> to vector<16x128xf32>
    %4 = vector.extract_strided_slice %2 {offsets = [0, 128], sizes = [16, 128], strides = [1, 1]} : vector<16x256xf32> to vector<16x128xf32>
    %5 = arith.mulf %3, %3 : vector<16x128xf32>
    %6 = arith.mulf %4, %4 : vector<16x128xf32>
    %7 = arith.addf %5, %6 : vector<16x128xf32>
    %c0_3 = arith.constant 0 : index
    %c0_4 = arith.constant 0 : index
    %8 = vector.load %arg3[%c0_3, %c0_4] : memref<16x128xf32, #tpu.memory_space<vmem>>, vector<16x128xf32>
    tpu.vector_store %arg3[%c0_3, %c0_4], %7 {strides = array<i32>} : memref<16x128xf32, #tpu.memory_space<vmem>>, vector<16x128xf32>,
    return
  }
  func.func @transform_0(%arg0: i32) -> (i32, i32) {
    %c0_i32 = arith.constant 0 : i32
    %c0_i32_0 = arith.constant 0 : i32
    return %arg0, %c0_i32 : i32, i32
  }
  func.func @transform_1(%arg0: i32) -> (i32, i32) {
    %c0_i32 = arith.constant 0 : i32
    %c0_i32_0 = arith.constant 0 : i32
    %c0_i32_1 = arith.constant 0 : i32
    return %c0_i32, %c0_i32_0 : i32, i32
  }
  func.func @transform_2(%arg0: i32) -> (i32, i32) {
    %c0_i32 = arith.constant 0 : i32
    %c0_i32_0 = arith.constant 0 : i32
    return %arg0, %c0_i32 : i32, i32
  }
}

</mosaic_0001>

<bundles_post_ra>
// kernel: tpu_custom_call.1
= control target key start
LH: loop header
LB: loop body
LE: loop exit
PB: predicated region body
PF: predicated region fallthrough
CT: control target
= control target key end

     0   :  { %7 = vsyncpa [#allocation3], 0  ;;  %s286_s0 = inlined_call_operand.hbm [shape: bf16[16,16], index: 0, kind: input, shape index: {}]   ;;  %s287_s1 = inlined_call_operand.hbm [shape: bf16[16,256], index: 1, kind: input, shape index: {}]   ;;  %s288_s2 = inlined_call_operand.hbm [shape: f32[16,128], index: 2, kind: output, shape index: {}]  }
   0x1   :  { %8 = vsyncpa [#allocation6], 0 }
   0x2   :  { %9 = vsyncpa [#allocation4], 0  ;;  %s221_s9 = smov [#allocation2]   ;;  %s149_s13 = scalar_lea.hbm %s286_s0, 128 }
   0x3   :  { %s15_s10 = sshll.u32 %s221_s9, 4  ;;  %p150_p0 = scmp.ne.s32.totalorder %s286_s0, %s149_s13  ;;  %s16_s10 = int_to_ptr.vmem [resolvable:$true] %s15_s10 }
   0x4   :  { %p153_p1 = scmp.lt.u32.totalorder %s149_s13, %s286_s0 }
   0x6   :  { %p155_p2 = pnand %p153_p1, %p150_p0 }
   0x8   :  { %158 = shalt.err (!%p155_p2)
}
   0x9   :  { %s159_s18 = scalar_lea.vmem %s16_s10, 128  ;;  %p164_p4 = scmp.lt.s32.totalorder %s16_s10, %s16_s10 }
   0xa   :  { %p160_p3 = scmp.ne.s32.totalorder %s16_s10, %s159_s18  ;;  %p165_p5 = scmp.lt.s32.totalorder %s159_s18, %s159_s18 }
   0xc   :  { %p166_p6 = por %p165_p5, %p164_p4 }
   0xe   :  { %p167_p7 = pnand %p166_p6, %p160_p3 }
  0x10   :  { %170 = shalt.err (!%p167_p7)
}
  0x11   :  { %s222_s19 = smov 64   ;;  %s223_s20 = smov 4  }
  0x12   :  { %21 = dma.hbm_to_vmem [thread:$0]  %s286_s0, 128, %s16_s10, [#allocation3], %s222_s19, %s222_s19, %s223_s20  }
  0x13   :  { %s224_s23 = smov [#allocation5]   ;;  %s171_s27 = scalar_lea.hbm %s287_s1, 256 }
  0x14   :  { %s27_s24 = sshll.u32 %s224_s23, 4  ;;  %p172_p8 = scmp.ne.s32.totalorder %s287_s1, %s171_s27  ;;  %s28_s24 = int_to_ptr.vmem [resolvable:$true] %s27_s24 }
  0x15   :  { %p175_p9 = scmp.lt.u32.totalorder %s171_s27, %s287_s1 }
  0x17   :  { %p177_p10 = pnand %p175_p9, %p172_p8 }
  0x19   :  { %180 = shalt.err (!%p177_p10)
}
  0x1a   :  { %s181_s4 = scalar_lea.vmem %s28_s24, 256  ;;  %p186_p12 = scmp.lt.s32.totalorder %s28_s24, %s28_s24 }
  0x1b   :  { %p182_p11 = scmp.ne.s32.totalorder %s28_s24, %s181_s4  ;;  %p187_p13 = scmp.lt.s32.totalorder %s181_s4, %s181_s4 }
  0x1d   :  { %p188_p0 = por %p187_p13, %p186_p12 }
  0x1f   :  { %p189_p1 = pnand %p188_p0, %p182_p11 }
  0x21   :  { %192 = shalt.err (!%p189_p1)
}
  0x22   :  { %s225_s0 = smov 128   ;;  %s226_s5 = smov 8  }
  0x23   :  { %33 = dma.hbm_to_vmem [thread:$0]  %s287_s1, 256, %s28_s24, [#allocation6], %s225_s0, %s225_s0, %s226_s5  }
  0x24   :  { %215 = dma.done.wait [#allocation3], 128  }
  0x25   :  { %216 = vsyncadd [#allocation3], 4294967168 }
  0x26   :  { %217 = dma.done.wait [#allocation6], 256  }
  0x27   :  { %218 = vsyncadd [#allocation6], 4294967040  ;;  %v227_v0 = vmov 0   ;;  %v145_v1 = vld [vmem:[#allocation5 + $0x4] ss:$8 sps:$4 sm:$0xff]   ;;  %v148_v3 = vld [vmem:[#allocation2] sm:$0xff]  }
  0x28   :  { %96 = vmatprep.mubr.bf16.mxu0 %v227_v0  ;;  %v147_v2 = vld [vmem:[#allocation5] ss:$8 sps:$4 sm:$0xff]   ;;  %64 = vmatprep.subr.bf16.mxu0 %v145_v1  ;;  %vm60_vm0 = vcmask 130048   ;;  %s228_s1 = smov [#allocation7]  }
  0x29   :  { %65 = vmatpush1.bf16.msra.mxu0 %v147_v2  ;;  %s120_s8 = sshll.u32 %s228_s1, 4  ;;  %s121_s8 = int_to_ptr.vmem [resolvable:$true] %s120_s8 }
  0x2a   :  { %s193_s9 = scalar_lea.vmem %s121_s8, 256  ;;  %p198_p3 = scmp.lt.s32.totalorder %s121_s8, %s121_s8 }
  0x2b   :  { %p194_p2 = scmp.ne.s32.totalorder %s121_s8, %s193_s9  ;;  %p199_p4 = scmp.lt.s32.totalorder %s193_s9, %s193_s9 }
  0x2c   :  { %136 = vmatmul.mubr.msk.bf16.vlgmr.msra.gmra.mrb[0].mxu0 %vm60_vm0, %v148_v3 }
  0x2d   :  { %p200_p5 = por %p199_p4, %p198_p3 }
  0x2f   :  { %p201_p6 = pnand %p200_p5, %p194_p2 }
  0xff   :  { %v98_v4 = vpop.f32.mrb[0].mxu0 }
 0x100   :  { %v107_v5 = vmul.f32 %v98_v4, %v98_v4  ;;  %v100_v6 = vpop.f32.mrb[1].mxu0 }
 0x101   :  { %v109_v7 = vmul.f32 %v100_v6, %v100_v6  ;;  %v102_v8 = vpop.f32.mrb[2].mxu0 }
 0x102   :  { %v108_v9 = vmul.f32 %v102_v8, %v102_v8  ;;  %v104_v10 = vpop.f32.mrb[3].mxu0 }
 0x103   :  { %v111_v11 = vadd.f32 %v109_v7, %v107_v5  ;;  %v110_v12 = vmul.f32 %v104_v10, %v104_v10 }
 0x105   :  { %113 = vst [vmem:[#allocation7] sm:$0xff] %v111_v11  ;;  %v112_v13 = vadd.f32 %v110_v12, %v108_v9 }
 0x107   :  { %114 = vst [vmem:[#allocation7 + $0x8] sm:$0xff] %v112_v13 }
 0x108   :  { %204 = shalt.err (!%p201_p6)
}
 0x109   :  { %s205_s12 = scalar_lea.hbm %s288_s2, 256 }
 0x10a   :  { %p206_p7 = scmp.ne.s32.totalorder %s288_s2, %s205_s12  ;;  %p209_p8 = scmp.lt.u32.totalorder %s205_s12, %s288_s2 }
 0x10c   :  { %p211_p9 = pnand %p209_p8, %p206_p7 }
 0x10e   :  { %214 = shalt.err (!%p211_p9)
}
 0x10f   :  { %126 = dma.vmem_to_hbm [thread:$0]  %s121_s8, 256, %s288_s2, [#allocation4], %s225_s0, %s225_s0, %s226_s5  }
 0x110   :  { %219 = dma.done.wait [#allocation4], 256  }
 0x111   :  { %220 = vsyncadd [#allocation4], 4294967040 }
 0x112   :  { %130 = vsyncpa [#allocation3], 1 }
 0x113   :  { %131 = vsyncpa [#allocation6], 1 }
 0x114   :  { %132 = vsyncpa [#allocation4], 1 }

</bundles_post_ra>
